<compile_context>
chip_gen: v7x
topology: tpu7x:2x2x1
jax: 0.10.0
libtpu: 0.0.40
codegen_flags: <defaults>
</compile_context>

<pallas_src>
import functools
import math

import jax
import jax.numpy as jnp
from jax import lax
from jax.experimental import pallas as pl
from jax.experimental.pallas import tpu as pltpu


def _fixed_basis_kernel(x_ref, o_ref, *, rmin, rmax, basis_size, norm_const):
    # x_ref: (1, TN) distances (lane-dense); o_ref: (basis_size, TN) basis values.
    step = (rmax - rmin) / (basis_size + 1)
    inv_step = 1.0 / step
    # Hoisted, pre-scaled centers: c_i / step = rmin/step + (i + 1), built on a
    # tiny (basis_size, 1) vreg instead of a full-tile iota+convert+affine.
    row = lax.broadcasted_iota(jnp.int32, (basis_size, 1), 0).astype(jnp.float32)
    centers_scaled = (rmin * inv_step + 1.0) + row          # (basis_size, 1)
    z = x_ref[...] * inv_step                               # (1, TN)
    diff = z - centers_scaled                               # (basis_size, TN) via broadcast
    o_ref[...] = (jnp.exp(-(diff * diff)) * (norm_const / 1.12)).astype(o_ref.dtype)


def _fixed_basis_reference(x, rmax, rmin=0.0, basis_size=10, normalization=True):
    # Pure-JAX e3nn.soft_one_hot_linspace(gaussian, cutoff=True) * norm.
    x = jnp.asarray(x, dtype=jnp.float32)
    values = jnp.linspace(rmin, rmax, basis_size + 2, dtype=jnp.float32)
    step = values[1] - values[0]
    values = values[1:-1]
    diff = (x[..., None] - values) / step
    out = jnp.exp(-(diff ** 2)) / 1.12
    norm = math.sqrt(basis_size) if normalization else 1.0
    return out * norm


def _round_up(v: int, m: int) -> int:
    return ((v + m - 1) // m) * m


def _tensorcores_per_chip() -> int:
    # Best-effort TensorCore count per chip: v7x has 2, v5e/v6e have 1.
    try:
        kind = str(getattr(jax.devices()[0], "device_kind", "")).lower()
        if "v7" in kind:
            return 2
    except Exception:
        pass
    return 1


def fixed_basis(radial_distance,
                rmax: float,
                rmin: float = 0.0,
                basis_function: str = "gaussian",
                basis_size: int = 10,
                normalization: bool = True,
                tile_n: int = 65536,
                out_dtype=jnp.float32,
                min_pallas_n: int = 1024):
    if basis_function != "gaussian":
        # TODO(synk): only the default 'gaussian' basis of soft_one_hot_linspace is implemented.
        raise NotImplementedError("only basis_function='gaussian' is implemented")

    norm_const = math.sqrt(basis_size) if normalization else 1.0
    orig_shape = radial_distance.shape
    x = jnp.asarray(radial_distance, dtype=jnp.float32).reshape(-1)
    n = x.shape[0]

    # Small-N fallback: launch + layout plumbing would exceed the actual work.
    if n < min_pallas_n:
        out = _fixed_basis_reference(x, rmax, rmin, basis_size, normalization)
        return out.astype(out_dtype).reshape(orig_shape + (basis_size,))

    # Lane-dense tile sizing.
    #   - multiple of 128, capped at tile_n and at the (128-rounded) problem size.
    #   - with tile_n=65536 and basis_size=10 the double-buffered blocks are
    #     ~5.5 MiB total -> comfortably inside every generation's scoped VMEM.
    #   - only on multi-TensorCore chips (v7x) is the grid forced to a balanced,
    #     core-multiple number of blocks; on v5e/v6e the grid is a serial loop
    #     and extra steps are pure per-step overhead.
    tile_n = max(128, (int(tile_n) // 128) * 128)
    tile = min(tile_n, _round_up(n, 128))
    cores = _tensorcores_per_chip()
    if cores >= 2 and n >= cores * 256:
        n_blocks = _round_up(max(pl.cdiv(n, tile), cores), cores)
        tile = min(tile, _round_up(pl.cdiv(n, n_blocks), 128))
    n_blocks = pl.cdiv(n, tile)

    x2d = x.reshape(1, n)

    kernel = functools.partial(
        _fixed_basis_kernel,
        rmin=float(rmin), rmax=float(rmax),
        basis_size=int(basis_size), norm_const=float(norm_const),
    )

    # Output is exactly (basis_size, n): a partial final block gets a clipped
    # writeback DMA, so no padded/garbage columns are ever written to HBM.
    out = pl.pallas_call(
        kernel,
        out_shape=jax.ShapeDtypeStruct((basis_size, n), out_dtype),
        grid_spec=pltpu.PrefetchScalarGridSpec(
            num_scalar_prefetch=0,
            grid=(n_blocks,),
            in_specs=[pl.BlockSpec((1, tile), lambda i: (0, i))],
            out_specs=pl.BlockSpec((basis_size, tile), lambda i: (0, i)),
        ),
        compiler_params=pltpu.CompilerParams(
            dimension_semantics=("parallel",),
        ),
    )(x2d)

    # (basis_size, n) -> (..., basis_size): layout plumbing for API parity with
    # the torch module (keep (basis_size, n) if the consumer can contract it).
    return out.T.reshape(orig_shape + (basis_size,))


if __name__ == "__main__":
    # Module config (FixedBasis has no trainable parameters).
    RMAX = 5.0
    RMIN = 0.0
    BASIS_SIZE = 10

    key = jax.random.PRNGKey(0)
    k0, k1, k2 = jax.random.split(key, 3)

    # (1) Typical edge count, multiple of 128: one big lane-dense tile
    #     (split into 2 balanced blocks automatically on v7x).
    n1 = 4096
    d1 = jax.random.uniform(k0, (n1,), jnp.float32, minval=0.0, maxval=RMAX)
    y1 = jax.block_until_ready(fixed_basis(d1, rmax=RMAX, rmin=RMIN,
                                           basis_size=BASIS_SIZE, normalization=True))
    r1 = _fixed_basis_reference(d1, RMAX, RMIN, BASIS_SIZE, True)
    assert y1.shape == (n1, BASIS_SIZE)
    assert float(jnp.max(jnp.abs(y1 - r1))) < 1e-5

    # (2) Ragged edge count + small tile -> multi-block grid, partial last block
    #     with a boundary-clipped writeback DMA.
    n2 = 3000
    d2 = jax.random.uniform(k1, (n2,), jnp.float32, minval=0.0, maxval=RMAX)
    y2 = jax.block_until_ready(fixed_basis(d2, rmax=RMAX, rmin=RMIN,
                                           basis_size=BASIS_SIZE, normalization=True,
                                           tile_n=1024))
    r2 = _fixed_basis_reference(d2, RMAX, RMIN, BASIS_SIZE, True)
    assert y2.shape == (n2, BASIS_SIZE)
    assert float(jnp.max(jnp.abs(y2 - r2))) < 1e-5

    # (3) bf16 writeback path (halves HBM store traffic for bf16 consumers).
    y3 = jax.block_until_ready(fixed_basis(d1, rmax=RMAX, rmin=RMIN,
                                           basis_size=BASIS_SIZE, normalization=True,
                                           out_dtype=jnp.bfloat16))
    assert y3.dtype == jnp.bfloat16
    assert float(jnp.max(jnp.abs(y3.astype(jnp.float32) - r1))) < 3e-2

    # (4) Tiny batched input takes the fused pure-JAX fallback, shape preserved.
    d4 = jax.random.uniform(k2, (2, 8), jnp.float32, minval=0.0, maxval=RMAX)
    y4 = jax.block_until_ready(fixed_basis(d4, rmax=RMAX))
    assert y4.shape == (2, 8, BASIS_SIZE)
    assert float(jnp.max(jnp.abs(y4 - _fixed_basis_reference(d4, RMAX)))) < 1e-5

    print("KERNEL_OK")
</pallas_src>

<mosaic_0001>
module attributes {stable_mosaic.version = 11 : i64} {
  func.func @_fixed_basis_kernel(%arg0: i32, %arg1: memref<1x4096xf32, #tpu.memory_space<vmem>>, %arg2: memref<10x4096xf32, #tpu.memory_space<vmem>>) attributes {dimension_semantics = [#tpu.dimension_semantics<parallel>], iteration_bounds = array<i64: 1>, scalar_prefetch = 0 : i64, scratch_operands = 0 : i64, tpu.core_type = #tpu.core_type<tc>, window_params = [{transform_indices = @transform_0, window_bounds = array<i64: 1, 4096>}, {transform_indices = @transform_1, window_bounds = array<i64: 10, 4096>}]} {
    %0 = tpu.iota {dimensions = array<i32: 0>} : vector<10x1xi32>
    %1 = arith.sitofp %0 : vector<10x1xi32> to vector<10x1xf32>
    %cst = arith.constant 1.000000e+00 : f32
    %2 = vector.broadcast %cst : f32 to vector<10x1xf32>
    %3 = arith.addf %2, %1 : vector<10x1xf32>
    %c0 = arith.constant 0 : index
    %c0_0 = arith.constant 0 : index
    %4 = vector.load %arg1[%c0, %c0_0] : memref<1x4096xf32, #tpu.memory_space<vmem>>, vector<1x4096xf32>
    %cst_1 = arith.constant 2.200000e+00 : f32
    %5 = vector.broadcast %cst_1 : f32 to vector<1x4096xf32>
    %6 = arith.mulf %4, %5 : vector<1x4096xf32>
    %7 = vector.broadcast %6 : vector<1x4096xf32> to vector<10x4096xf32>
    %8 = vector.broadcast %3 : vector<10x1xf32> to vector<10x4096xf32>
    %9 = arith.subf %7, %8 : vector<10x4096xf32>
    %10 = arith.mulf %9, %9 : vector<10x4096xf32>
    %cst_2 = arith.constant 0.000000e+00 : f32
    %11 = vector.broadcast %cst_2 : f32 to vector<10x4096xf32>
    %12 = arith.subf %11, %10 : vector<10x4096xf32>
    %13 = math.exp %12 : vector<10x4096xf32>
    %cst_3 = arith.constant 2.82346225 : f32
    %14 = vector.broadcast %cst_3 : f32 to vector<10x4096xf32>
    %15 = arith.mulf %13, %14 : vector<10x4096xf32>
    %c0_4 = arith.constant 0 : index
    %c0_5 = arith.constant 0 : index
    %16 = vector.load %arg2[%c0_4, %c0_5] : memref<10x4096xf32, #tpu.memory_space<vmem>>, vector<10x4096xf32>
    tpu.vector_store %arg2[%c0_4, %c0_5], %15 {strides = array<i32>} : memref<10x4096xf32, #tpu.memory_space<vmem>>, vector<10x4096xf32>,
    return
  }
  func.func @transform_0(%arg0: i32) -> (i32, i32) {
    %c0_i32 = arith.constant 0 : i32
    %c0_i32_0 = arith.constant 0 : i32
    return %c0_i32, %arg0 : i32, i32
  }
  func.func @transform_1(%arg0: i32) -> (i32, i32) {
    %c0_i32 = arith.constant 0 : i32
    %c0_i32_0 = arith.constant 0 : i32
    return %c0_i32, %arg0 : i32, i32
  }
}

</mosaic_0001>

<bundles_post_ra>
// kernel: tpu_custom_call.1
= control target key start
LH: loop header
LB: loop body
LE: loop exit
PB: predicated region body
PF: predicated region fallthrough
CT: control target
= control target key end

     0   :  { %6 = vsyncpa [#allocation3], 0  ;;  %s1157_s0 = inlined_call_operand.hbm [shape: f32[1,4096], index: 0, kind: input, shape index: {}]   ;;  %s1158_s1 = inlined_call_operand.hbm [shape: f32[10,4096], index: 1, kind: output, shape index: {}]  }
   0x1   :  { %7 = vsyncpa [#allocation4], 0  ;;  %s845_s6 = smov [#allocation2]   ;;  %s797_s10 = scalar_lea.hbm %s1157_s0, 512 }
   0x2   :  { %s14_s7 = sshll.u32 %s845_s6, 4  ;;  %p798_p0 = scmp.ne.s32.totalorder %s1157_s0, %s797_s10  ;;  %s15_s7 = int_to_ptr.vmem [resolvable:$true] %s14_s7 }
   0x3   :  { %p801_p1 = scmp.lt.u32.totalorder %s797_s10, %s1157_s0 }
   0x5   :  { %p803_p2 = pnand %p801_p1, %p798_p0 }
   0x7   :  { %806 = shalt.err (!%p803_p2)
}
   0x8   :  { %s807_s15 = scalar_lea.vmem %s15_s7, 512  ;;  %p812_p4 = scmp.lt.s32.totalorder %s15_s7, %s15_s7 }
   0x9   :  { %p808_p3 = scmp.ne.s32.totalorder %s15_s7, %s807_s15  ;;  %p813_p5 = scmp.lt.s32.totalorder %s807_s15, %s807_s15 }
   0xb   :  { %p814_p6 = por %p813_p5, %p812_p4 }
   0xd   :  { %p815_p7 = pnand %p814_p6, %p808_p3 }
   0xf   :  { %818 = shalt.err (!%p815_p7)
}
  0x10   :  { %17 = dma.hbm_to_vmem [thread:$0]  %s1157_s0, 512, %s15_s7, [#allocation3]  }
  0x11   :  { %841 = dma.done.wait [#allocation3], 512  }
  0x12   :  { %842 = vsyncadd [#allocation3], 4294966784  ;;  %v21_v0 = vlaneseq  ;;  %v28_v10 = vld [vmem:[#allocation2] sm:$0xff]  ;;  %v29_v14 = vld [vmem:[#allocation2 + $0x8] sm:$0xff]  ;;  %s846_s0 = smov [#allocation5]  }
  0x13   :  { %v30_v15 = vld [vmem:[#allocation2 + $0x10] sm:$0xff]  ;;  %v32_v18 = vmul.f32 2.2, %v28_v10  ;;  %v31_v19 = vld [vmem:[#allocation2 + $0x18] sm:$0xff]  ;;  %v891_v20 = vmul.f32 2.2, %v29_v14 }
  0x14   :  { %v22_v1 = vshrl.u32 %v21_v0, 7  ;;  %v893_v21 = vmul.f32 2.2, %v30_v15  ;;  %v895_v22 = vmul.f32 2.2, %v31_v19  ;;  %s653_s18 = sshll.u32 %s846_s0, 4  ;;  %s654_s18 = int_to_ptr.vmem [resolvable:$true] %s653_s18 }
  0x15   :  { %s819_s19 = scalar_lea.vmem %s654_s18, 8192  ;;  %p824_p9 = scmp.lt.s32.totalorder %s654_s18, %s654_s18 }
  0x16   :  { %v23_v2 = vadd.s32 8, %v22_v1  ;;  %v24_v3 = vcvt.s32.f32 %v22_v1  ;;  %v871_v4 = vsub.s32 0, %v22_v1  ;;  %v873_v5 = vsub.s32 1, %v22_v1  ;;  %p820_p8 = scmp.ne.s32.totalorder %s654_s18, %s819_s19  ;;  %p825_p10 = scmp.lt.s32.totalorder %s819_s19, %s819_s19 }
  0x17   :  { %v875_v7 = vsub.s32 2, %v22_v1  ;;  %v877_v8 = vsub.s32 3, %v22_v1  ;;  %v879_v9 = vsub.s32 4, %v22_v1  ;;  %v881_v11 = vsub.s32 5, %v22_v1 }
  0x18   :  { %v25_v6 = vcvt.s32.f32 %v23_v2  ;;  %v883_v12 = vsub.s32 6, %v22_v1  ;;  %v885_v13 = vsub.s32 7, %v22_v1  ;;  %v887_v16 = vadd.f32 1.0, %v24_v3  ;;  %p826_p11 = por %p825_p10, %p824_p9 }
  0x19   :  { %v898_v23 = vrot.slane %v32_v18, %v871_v4  ;;  %v901_v24 = vrot.slane %v32_v18, %v873_v5  ;;  %v904_v25 = vrot.slane %v32_v18, %v875_v7  ;;  %v907_v26 = vrot.slane %v32_v18, %v877_v8 }
  0x1a   :  { %v889_v17 = vadd.f32 1.0, %v25_v6  ;;  %v910_v27 = vrot.slane %v32_v18, %v879_v9  ;;  %v913_v28 = vrot.slane %v32_v18, %v881_v11  ;;  %v916_v29 = vrot.slane %v32_v18, %v883_v12  ;;  %p827_p12 = pnand %p826_p11, %p820_p8 }
  0x1b   :  { %v919_v30 = vrot.slane %v32_v18, %v885_v13  ;;  %v200_v31 = vsub.f32 %v898_v23, %v887_v16  ;;  %v201_v32 = vsub.f32 %v901_v24, %v887_v16  ;;  %v202_v33 = vsub.f32 %v904_v25, %v887_v16 }
  0x1c   :  { %v203_v34 = vsub.f32 %v907_v26, %v887_v16  ;;  %v204_v35 = vsub.f32 %v910_v27, %v887_v16  ;;  %v205_v36 = vsub.f32 %v913_v28, %v887_v16  ;;  %v206_v37 = vsub.f32 %v916_v29, %v887_v16 }
  0x1d   :  { %v207_v38 = vsub.f32 %v919_v30, %v887_v16  ;;  %v264_v39 = vmul.f32 %v200_v31, %v200_v31  ;;  %v265_v40 = vmul.f32 %v201_v32, %v201_v32  ;;  %v266_v41 = vmul.f32 %v202_v33, %v202_v33 }
  0x1e   :  { %v267_v42 = vmul.f32 %v203_v34, %v203_v34  ;;  %v268_v43 = vmul.f32 %v204_v35, %v204_v35  ;;  %v269_v44 = vmul.f32 %v205_v36, %v205_v36  ;;  %v270_v45 = vmul.f32 %v206_v37, %v206_v37 }
  0x1f   :  { %v271_v46 = vmul.f32 %v207_v38, %v207_v38  ;;  %v328_v47 = vsub.f32 0.0, %v264_v39  ;;  %v329_v48 = vsub.f32 0.0, %v265_v40  ;;  %v330_v49 = vsub.f32 0.0, %v266_v41 }
  0x20   :  { %v331_v50 = vsub.f32 0.0, %v267_v42  ;;  %v332_v51 = vsub.f32 0.0, %v268_v43  ;;  %v333_v52 = vsub.f32 0.0, %v269_v44  ;;  %v334_v53 = vsub.f32 0.0, %v270_v45 }
  0x21   :  { %v335_v54 = vsub.f32 0.0, %v271_v46  ;;  %v392_v55 = vmul.f32 1.442695, %v328_v47  ;;  %v394_v56 = vmul.f32 1.442695, %v329_v48  ;;  %v939_v58 = vrot.slane %v891_v20, %v871_v4 }
  0x22   :  { %v396_v57 = vmul.f32 1.442695, %v330_v49  ;;  %v398_v59 = vmul.f32 1.442695, %v331_v50  ;;  %v400_v60 = vmul.f32 1.442695, %v332_v51  ;;  %v943_v62 = vrot.slane %v891_v20, %v873_v5 }
  0x23   :  { %v402_v61 = vmul.f32 1.442695, %v333_v52  ;;  %669 = vpow2.f32 %v392_v55  ;;  %v404_v63 = vmul.f32 1.442695, %v334_v53  ;;  %v406_v0 = vmul.f32 1.442695, %v335_v54 }
  0x24   :  { %v208_v1 = vsub.f32 %v939_v58, %v887_v16  ;;  %671 = vpow2.f32 %v394_v56  ;;  %v209_v2 = vsub.f32 %v943_v62, %v887_v16  ;;  %v951_v3 = vrot.slane %v891_v20, %v875_v7 }
  0x25   :  { %v955_v6 = vrot.slane %v891_v20, %v877_v8  ;;  %673 = vpow2.f32 %v396_v57  ;;  %v959_v14 = vrot.slane %v891_v20, %v879_v9  ;;  %v963_v15 = vrot.slane %v891_v20, %v881_v11 }
  0x26   :  { %v272_v10 = vmul.f32 %v208_v1, %v208_v1  ;;  %675 = vpow2.f32 %v398_v59  ;;  %v273_v18 = vmul.f32 %v209_v2, %v209_v2  ;;  %v210_v19 = vsub.f32 %v951_v3, %v887_v16 }
  0x27   :  { %v211_v31 = vsub.f32 %v955_v6, %v887_v16  ;;  %677 = vpow2.f32 %v400_v60  ;;  %v212_v33 = vsub.f32 %v959_v14, %v887_v16  ;;  %v213_v34 = vsub.f32 %v963_v15, %v887_v16 }
  0x28   :  { %v336_v32 = vsub.f32 0.0, %v272_v10  ;;  %679 = vpow2.f32 %v402_v61  ;;  %v337_v35 = vsub.f32 0.0, %v273_v18  ;;  %v274_v36 = vmul.f32 %v210_v19, %v210_v19 }
  0x29   :  { %v275_v37 = vmul.f32 %v211_v31, %v211_v31  ;;  %681 = vpow2.f32 %v404_v63  ;;  %v276_v39 = vmul.f32 %v212_v33, %v212_v33  ;;  %v277_v40 = vmul.f32 %v213_v34, %v213_v34 }
  0x2a   :  { %v408_v38 = vmul.f32 1.442695, %v336_v32  ;;  %683 = vpow2.f32 %v406_v0  ;;  %v410_v41 = vmul.f32 1.442695, %v337_v35  ;;  %v338_v42 = vsub.f32 0.0, %v274_v36 }
  0x2b   :  { %v339_v43 = vsub.f32 0.0, %v275_v37  ;;  %v340_v44 = vsub.f32 0.0, %v276_v39  ;;  %v341_v45 = vsub.f32 0.0, %v277_v40  ;;  %v975_v46 = vrot.slane %v891_v20, %v883_v12 }
  0x2c   :  { %685 = vpow2.f32 %v408_v38  ;;  %v412_v47 = vmul.f32 1.442695, %v338_v42  ;;  %v979_v49 = vrot.slane %v891_v20, %v885_v13  ;;  %v985_v54 = vrot.slane %v893_v21, %v871_v4 }
  0x2d   :  { %687 = vpow2.f32 %v410_v41  ;;  %v414_v48 = vmul.f32 1.442695, %v339_v43  ;;  %v670_v50 = vpop.eup %669  ;;  %v416_v51 = vmul.f32 1.442695, %v340_v44  ;;  %v418_v52 = vmul.f32 1.442695, %v341_v45 }
  0x2e   :  { %v214_v53 = vsub.f32 %v975_v46, %v887_v16  ;;  %v672_v55 = vpop.eup %671  ;;  %v520_v56 = vmul.f32 2.8234622, %v670_v50  ;;  %689 = vpow2.f32 %v412_v47  ;;  %v215_v57 = vsub.f32 %v979_v49, %v887_v16 }
  0x2f   :  { %v991_v20 = vrot.slane %v893_v21, %v873_v5  ;;  %v674_v59 = vpop.eup %673  ;;  %v521_v60 = vmul.f32 2.8234622, %v672_v55  ;;  %691 = vpow2.f32 %v414_v48  ;;  %v216_v63 = vsub.f32 %v985_v54, %v887_v16 }
  0x30   :  { %v278_v61 = vmul.f32 %v214_v53, %v214_v53  ;;  %v676_v0 = vpop.eup %675  ;;  %584 = vst [vmem:[#allocation5] sm:$0xff] %v520_v56  ;;  %v522_v1 = vmul.f32 2.8234622, %v674_v59  ;;  %693 = vpow2.f32 %v416_v51  ;;  %v279_v2 = vmul.f32 %v215_v57, %v215_v57 }
  0x31   :  { %v217_v10 = vsub.f32 %v991_v20, %v887_v16  ;;  %v678_v18 = vpop.eup %677  ;;  %585 = vst [vmem:[#allocation5 + $0x8] sm:$0xff] %v521_v60  ;;  %v523_v19 = vmul.f32 2.8234622, %v676_v0  ;;  %695 = vpow2.f32 %v418_v52  ;;  %v280_v32 = vmul.f32 %v216_v63, %v216_v63 }
  0x32   :  { %v342_v31 = vsub.f32 0.0, %v278_v61  ;;  %v680_v33 = vpop.eup %679  ;;  %586 = vst [vmem:[#allocation5 + $0x10] sm:$0xff] %v522_v1  ;;  %v524_v34 = vmul.f32 2.8234622, %v678_v18  ;;  %v343_v35 = vsub.f32 0.0, %v279_v2  ;;  %v999_v37 = vrot.slane %v893_v21, %v875_v7 }
  0x33   :  { %v281_v36 = vmul.f32 %v217_v10, %v217_v10  ;;  %v682_v38 = vpop.eup %681  ;;  %587 = vst [vmem:[#allocation5 + $0x18] sm:$0xff] %v523_v19  ;;  %v525_v39 = vmul.f32 2.8234622, %v680_v33  ;;  %v344_v41 = vsub.f32 0.0, %v280_v32  ;;  %v1003_v42 = vrot.slane %v893_v21, %v877_v8 }
  0x34   :  { %v420_v40 = vmul.f32 1.442695, %v342_v31  ;;  %v684_v43 = vpop.eup %683  ;;  %588 = vst [vmem:[#allocation5 + $0x20] sm:$0xff] %v524_v34  ;;  %v526_v44 = vmul.f32 2.8234622, %v682_v38  ;;  %v218_v48 = vsub.f32 %v999_v37, %v887_v16  ;;  %v1011_v63 = vrot.slane %v893_v21, %v879_v9 }
  0x35   :  { %v422_v45 = vmul.f32 1.442695, %v343_v35  ;;  %v345_v47 = vsub.f32 0.0, %v281_v36  ;;  %589 = vst [vmem:[#allocation5 + $0x28] sm:$0xff] %v525_v39  ;;  %v527_v51 = vmul.f32 2.8234622, %v684_v43  ;;  %v219_v53 = vsub.f32 %v1003_v42, %v887_v16 }
  0x36   :  { %v686_v50 = vpop.eup %685  ;;  %697 = vpow2.f32 %v420_v40  ;;  %v424_v52 = vmul.f32 1.442695, %v344_v41  ;;  %590 = vst [vmem:[#allocation5 + $0x30] sm:$0xff] %v526_v44  ;;  %v282_v59 = vmul.f32 %v218_v48, %v218_v48  ;;  %v1015_v2 = vrot.slane %v893_v21, %v881_v11 }
  0x37   :  { %v688_v55 = vpop.eup %687  ;;  %v528_v56 = vmul.f32 2.8234622, %v686_v50  ;;  %699 = vpow2.f32 %v422_v45  ;;  %v426_v57 = vmul.f32 1.442695, %v345_v47  ;;  %591 = vst [vmem:[#allocation5 + $0x38] sm:$0xff] %v527_v51  ;;  %v283_v61 = vmul.f32 %v219_v53, %v219_v53 }
  0x38   :  { %v529_v60 = vmul.f32 2.8234622, %v688_v55  ;;  %701 = vpow2.f32 %v424_v52  ;;  %v690_v0 = vpop.eup %689  ;;  %v346_v1 = vsub.f32 0.0, %v282_v59  ;;  %v1019_v10 = vrot.slane %v893_v21, %v883_v12 }
  0x39   :  { %592 = vst [vmem:[#allocation5 + $0x40] sm:$0xff] %v528_v56  ;;  %703 = vpow2.f32 %v426_v57  ;;  %v692_v18 = vpop.eup %691  ;;  %v530_v19 = vmul.f32 2.8234622, %v690_v0  ;;  %v347_v31 = vsub.f32 0.0, %v283_v61  ;;  %v220_v32 = vsub.f32 %v1011_v63, %v887_v16 }
  0x3a   :  { %593 = vst [vmem:[#allocation5 + $0x48] sm:$0xff] %v529_v60  ;;  %v1025_v33 = vrot.slane %v893_v21, %v885_v13  ;;  %v694_v34 = vpop.eup %693  ;;  %v531_v35 = vmul.f32 2.8234622, %v692_v18  ;;  %v428_v36 = vmul.f32 1.442695, %v346_v1  ;;  %v221_v38 = vsub.f32 %v1015_v2, %v887_v16 }
  0x3b   :  { %v222_v39 = vsub.f32 %v1019_v10, %v887_v16  ;;  %v696_v40 = vpop.eup %695  ;;  %594 = vst [vmem:[#allocation5 + $0x50] sm:$0xff] %v530_v19  ;;  %v532_v41 = vmul.f32 2.8234622, %v694_v34  ;;  %v430_v43 = vmul.f32 1.442695, %v347_v31  ;;  %v284_v44 = vmul.f32 %v220_v32, %v220_v32 }
  0x3c   :  { %v223_v45 = vsub.f32 %v1025_v33, %v887_v16  ;;  %595 = vst [vmem:[#allocation5 + $0x58] sm:$0xff] %v531_v35  ;;  %v533_v21 = vmul.f32 2.8234622, %v696_v40  ;;  %705 = vpow2.f32 %v428_v36  ;;  %v285_v47 = vmul.f32 %v221_v38, %v221_v38 }
  0x3d   :  { %v286_v48 = vmul.f32 %v222_v39, %v222_v39  ;;  %596 = vst [vmem:[#allocation5 + $0x60] sm:$0xff] %v532_v41  ;;  %707 = vpow2.f32 %v430_v43  ;;  %v348_v50 = vsub.f32 0.0, %v284_v44  ;;  %v1035_v52 = vrot.slane %v895_v22, %v871_v4 }
  0x3e   :  { %v287_v51 = vmul.f32 %v223_v45, %v223_v45  ;;  %597 = vst [vmem:[#allocation5 + $0x68] sm:$0xff] %v533_v21  ;;  %v349_v53 = vsub.f32 0.0, %v285_v47  ;;  %v1039_v56 = vrot.slane %v895_v22, %v873_v5  ;;  %v1043_v57 = vrot.slane %v895_v22, %v875_v7 }
  0x3f   :  { %v350_v55 = vsub.f32 0.0, %v286_v48  ;;  %v432_v60 = vmul.f32 1.442695, %v348_v50  ;;  %v224_v0 = vsub.f32 %v1035_v52, %v887_v16  ;;  %v1049_v4 = vrot.slane %v895_v22, %v877_v8 }
  0x40   :  { %v698_v59 = vpop.eup %697  ;;  %v351_v61 = vsub.f32 0.0, %v287_v51  ;;  %v434_v19 = vmul.f32 1.442695, %v349_v53  ;;  %v225_v5 = vsub.f32 %v1039_v56, %v887_v16  ;;  %v226_v8 = vsub.f32 %v1043_v57, %v887_v16 }
  0x41   :  { %v700_v1 = vpop.eup %699  ;;  %v534_v18 = vmul.f32 2.8234622, %v698_v59  ;;  %v436_v31 = vmul.f32 1.442695, %v350_v55  ;;  %709 = vpow2.f32 %v432_v60  ;;  %v288_v35 = vmul.f32 %v224_v0, %v224_v0 }
  0x42   :  { %v702_v32 = vpop.eup %701  ;;  %v535_v7 = vmul.f32 2.8234622, %v700_v1  ;;  %v438_v34 = vmul.f32 1.442695, %v351_v61  ;;  %711 = vpow2.f32 %v434_v19  ;;  %v289_v39 = vmul.f32 %v225_v5, %v225_v5 }
  0x43   :  { %v704_v36 = vpop.eup %703  ;;  %598 = vst [vmem:[#allocation5 + $0x70] sm:$0xff] %v534_v18  ;;  %v536_v38 = vmul.f32 2.8234622, %v702_v32  ;;  %713 = vpow2.f32 %v436_v31  ;;  %v352_v41 = vsub.f32 0.0, %v288_v35  ;;  %v227_v43 = vsub.f32 %v1049_v4, %v887_v16 }
  0x44   :  { %599 = vst [vmem:[#allocation5 + $0x78] sm:$0xff] %v535_v7  ;;  %v537_v40 = vmul.f32 2.8234622, %v704_v36  ;;  %715 = vpow2.f32 %v438_v34  ;;  %v353_v44 = vsub.f32 0.0, %v289_v39  ;;  %v290_v45 = vmul.f32 %v226_v8, %v226_v8 }
  0x45   :  { %600 = vst [vmem:[#allocation5 + $0x80] sm:$0xff] %v536_v38  ;;  %v1059_v21 = vrot.slane %v895_v22, %v879_v9  ;;  %v440_v47 = vmul.f32 1.442695, %v352_v41  ;;  %v291_v48 = vmul.f32 %v227_v43, %v227_v43  ;;  %v1063_v50 = vrot.slane %v895_v22, %v881_v11 }
  0x46   :  { %601 = vst [vmem:[#allocation5 + $0x88] sm:$0xff] %v537_v40  ;;  %v1067_v51 = vrot.slane %v895_v22, %v883_v12  ;;  %v706_v53 = vpop.eup %705  ;;  %v442_v55 = vmul.f32 1.442695, %v353_v44  ;;  %v354_v59 = vsub.f32 0.0, %v290_v45  ;;  %v1073_v9 = vrot.slane %v895_v22, %v885_v13 }
  0x47   :  { %v228_v60 = vsub.f32 %v1059_v21, %v887_v16  ;;  %v708_v61 = vpop.eup %707  ;;  %v538_v0 = vmul.f32 2.8234622, %v706_v53  ;;  %717 = vpow2.f32 %v440_v47  ;;  %v355_v1 = vsub.f32 0.0, %v291_v48 }
  0x48   :  { %v229_v11 = vsub.f32 %v1063_v50, %v887_v16  ;;  %v539_v18 = vmul.f32 2.8234622, %v708_v61  ;;  %719 = vpow2.f32 %v442_v55  ;;  %v444_v12 = vmul.f32 1.442695, %v354_v59 }
  0x49   :  { %v292_v19 = vmul.f32 %v228_v60, %v228_v60  ;;  %602 = vst [vmem:[#allocation5 + $0x90] sm:$0xff] %v538_v0  ;;  %v446_v31 = vmul.f32 1.442695, %v355_v1  ;;  %v230_v32 = vsub.f32 %v1067_v51, %v887_v16  ;;  %v231_v13 = vsub.f32 %v1073_v9, %v887_v16 }
  0x4a   :  { %v293_v5 = vmul.f32 %v229_v11, %v229_v11  ;;  %603 = vst [vmem:[#allocation5 + $0x98] sm:$0xff] %v539_v18  ;;  %721 = vpow2.f32 %v444_v12  ;;  %v232_v7 = vsub.f32 %v898_v23, %v889_v17  ;;  %v233_v34 = vsub.f32 %v901_v24, %v889_v17 }
  0x4b   :  { %v356_v22 = vsub.f32 0.0, %v292_v19  ;;  %v710_v35 = vpop.eup %709  ;;  %723 = vpow2.f32 %v446_v31  ;;  %v294_v38 = vmul.f32 %v230_v32, %v230_v32  ;;  %v295_v39 = vmul.f32 %v231_v13, %v231_v13 }
  0x4c   :  { %v357_v36 = vsub.f32 0.0, %v293_v5  ;;  %v712_v8 = vpop.eup %711  ;;  %v540_v40 = vmul.f32 2.8234622, %v710_v35  ;;  %v296_v43 = vmul.f32 %v232_v7, %v232_v7  ;;  %v297_v44 = vmul.f32 %v233_v34, %v233_v34 }
  0x4d   :  { %v448_v41 = vmul.f32 1.442695, %v356_v22  ;;  %v714_v16 = vpop.eup %713  ;;  %v541_v45 = vmul.f32 2.8234622, %v712_v8  ;;  %v358_v48 = vsub.f32 0.0, %v294_v38  ;;  %v359_v53 = vsub.f32 0.0, %v295_v39 }
  0x4e   :  { %v450_v47 = vmul.f32 1.442695, %v357_v36  ;;  %v716_v55 = vpop.eup %715  ;;  %604 = vst [vmem:[#allocation5 + $0xa0] sm:$0xff] %v540_v40  ;;  %v542_v23 = vmul.f32 2.8234622, %v714_v16  ;;  %v360_v24 = vsub.f32 0.0, %v296_v43  ;;  %v234_v18 = vsub.f32 %v904_v25, %v889_v17 }
  0x4f   :  { %725 = vpow2.f32 %v448_v41  ;;  %v361_v59 = vsub.f32 0.0, %v297_v44  ;;  %605 = vst [vmem:[#allocation5 + $0xa8] sm:$0xff] %v541_v45  ;;  %v543_v60 = vmul.f32 2.8234622, %v716_v55  ;;  %v452_v61 = vmul.f32 1.442695, %v358_v48 }
  0x50   :  { %727 = vpow2.f32 %v450_v47  ;;  %v454_v0 = vmul.f32 1.442695, %v359_v53  ;;  %606 = vst [vmem:[#allocation5 + $0xb0] sm:$0xff] %v542_v23  ;;  %v456_v1 = vmul.f32 1.442695, %v360_v24  ;;  %v235_v12 = vsub.f32 %v907_v26, %v889_v17 }
  0x51   :  { %v458_v11 = vmul.f32 1.442695, %v361_v59  ;;  %v718_v19 = vpop.eup %717  ;;  %607 = vst [vmem:[#allocation5 + $0xb8] sm:$0xff] %v543_v60  ;;  %729 = vpow2.f32 %v452_v61  ;;  %v236_v31 = vsub.f32 %v910_v27, %v889_v17  ;;  %v237_v5 = vsub.f32 %v913_v28, %v889_v17 }
  0x52   :  { %v238_v32 = vsub.f32 %v916_v29, %v889_v17  ;;  %v720_v13 = vpop.eup %719  ;;  %v544_v22 = vmul.f32 2.8234622, %v718_v19  ;;  %731 = vpow2.f32 %v454_v0  ;;  %v298_v7 = vmul.f32 %v234_v18, %v234_v18 }
  0x53   :  { %v299_v25 = vmul.f32 %v235_v12, %v235_v12  ;;  %v545_v34 = vmul.f32 2.8234622, %v720_v13  ;;  %733 = vpow2.f32 %v456_v1  ;;  %v300_v26 = vmul.f32 %v236_v31, %v236_v31 }
  0x54   :  { %v301_v35 = vmul.f32 %v237_v5, %v237_v5  ;;  %v722_v36 = vpop.eup %721  ;;  %608 = vst [vmem:[#allocation5 + $0xc0] sm:$0xff] %v544_v22  ;;  %735 = vpow2.f32 %v458_v11  ;;  %v362_v38 = vsub.f32 0.0, %v298_v7  ;;  %v302_v39 = vmul.f32 %v238_v32, %v238_v32 }
  0x55   :  { %v363_v27 = vsub.f32 0.0, %v299_v25  ;;  %v724_v8 = vpop.eup %723  ;;  %609 = vst [vmem:[#allocation5 + $0xc8] sm:$0xff] %v545_v34  ;;  %v546_v28 = vmul.f32 2.8234622, %v722_v36  ;;  %v364_v40 = vsub.f32 0.0, %v300_v26  ;;  %v239_v41 = vsub.f32 %v919_v30, %v889_v17 }
  0x56   :  { %v365_v29 = vsub.f32 0.0, %v301_v35  ;;  %v547_v43 = vmul.f32 2.8234622, %v724_v8  ;;  %v460_v44 = vmul.f32 1.442695, %v362_v38  ;;  %v240_v45 = vsub.f32 %v939_v58, %v889_v17 }
  0x57   :  { %v462_v16 = vmul.f32 1.442695, %v363_v27  ;;  %610 = vst [vmem:[#allocation5 + $0xd0] sm:$0xff] %v546_v28  ;;  %v464_v47 = vmul.f32 1.442695, %v364_v40  ;;  %v366_v53 = vsub.f32 0.0, %v302_v39  ;;  %v303_v55 = vmul.f32 %v239_v41, %v239_v41 }
  0x58   :  { %v466_v48 = vmul.f32 1.442695, %v365_v29  ;;  %611 = vst [vmem:[#allocation5 + $0xd8] sm:$0xff] %v547_v43  ;;  %737 = vpow2.f32 %v460_v44  ;;  %v304_v24 = vmul.f32 %v240_v45, %v240_v45  ;;  %v241_v59 = vsub.f32 %v943_v62, %v889_v17 }
  0x59   :  { %v726_v23 = vpop.eup %725  ;;  %v242_v30 = vsub.f32 %v951_v3, %v889_v17  ;;  %739 = vpow2.f32 %v462_v16  ;;  %v468_v0 = vmul.f32 1.442695, %v366_v53  ;;  %v367_v58 = vsub.f32 0.0, %v303_v55 }
  0x5a   :  { %v728_v60 = vpop.eup %727  ;;  %v548_v61 = vmul.f32 2.8234622, %v726_v23  ;;  %741 = vpow2.f32 %v464_v47  ;;  %v368_v11 = vsub.f32 0.0, %v304_v24  ;;  %v305_v18 = vmul.f32 %v241_v59, %v241_v59 }
  0x5b   :  { %v549_v1 = vmul.f32 2.8234622, %v728_v60  ;;  %v730_v12 = vpop.eup %729  ;;  %743 = vpow2.f32 %v466_v48  ;;  %v470_v19 = vmul.f32 1.442695, %v367_v58  ;;  %v306_v31 = vmul.f32 %v242_v30, %v242_v30 }
  0x5c   :  { %612 = vst [vmem:[#allocation5 + $0xe0] sm:$0xff] %v548_v61  ;;  %v243_v62 = vsub.f32 %v955_v6, %v889_v17  ;;  %v732_v5 = vpop.eup %731  ;;  %v550_v3 = vmul.f32 2.8234622, %v730_v12  ;;  %745 = vpow2.f32 %v468_v0  ;;  %v472_v32 = vmul.f32 1.442695, %v368_v11 }
  0x5d   :  { %613 = vst [vmem:[#allocation5 + $0xe8] sm:$0xff] %v549_v1  ;;  %v369_v13 = vsub.f32 0.0, %v305_v18  ;;  %v734_v22 = vpop.eup %733  ;;  %v551_v7 = vmul.f32 2.8234622, %v732_v5  ;;  %747 = vpow2.f32 %v470_v19  ;;  %v370_v25 = vsub.f32 0.0, %v306_v31 }
  0x5e   :  { %v307_v34 = vmul.f32 %v243_v62, %v243_v62  ;;  %v736_v26 = vpop.eup %735  ;;  %614 = vst [vmem:[#allocation5 + $0xf0] sm:$0xff] %v550_v3  ;;  %v552_v35 = vmul.f32 2.8234622, %v734_v22  ;;  %749 = vpow2.f32 %v472_v32  ;;  %v244_v38 = vsub.f32 %v959_v14, %v889_v17 }
  0x5f   :  { %v474_v36 = vmul.f32 1.442695, %v369_v13  ;;  %615 = vst [vmem:[#allocation5 + $0xf8] sm:$0xff] %v551_v7  ;;  %v553_v6 = vmul.f32 2.8234622, %v736_v26  ;;  %v245_v8 = vsub.f32 %v963_v15, %v889_v17  ;;  %v246_v40 = vsub.f32 %v975_v46, %v889_v17 }
  0x60   :  { %v476_v27 = vmul.f32 1.442695, %v370_v25  ;;  %v371_v39 = vsub.f32 0.0, %v307_v34  ;;  %616 = vst [vmem:[#allocation5 + $0x100] sm:$0x3] %v552_v35  ;;  %v308_v28 = vmul.f32 %v244_v38, %v244_v38  ;;  %v247_v29 = vsub.f32 %v979_v49, %v889_v17 }
  0x61   :  { %751 = vpow2.f32 %v474_v36  ;;  %617 = vst [vmem:[#allocation5 + $0x108] sm:$0x3] %v553_v6  ;;  %v309_v14 = vmul.f32 %v245_v8, %v245_v8  ;;  %v248_v43 = vsub.f32 %v985_v54, %v889_v17  ;;  %v310_v45 = vmul.f32 %v246_v40, %v246_v40 }
  0x62   :  { %753 = vpow2.f32 %v476_v27  ;;  %v478_v41 = vmul.f32 1.442695, %v371_v39  ;;  %v738_v44 = vpop.eup %737  ;;  %v372_v16 = vsub.f32 0.0, %v308_v28  ;;  %v311_v15 = vmul.f32 %v247_v29, %v247_v29 }
  0x63   :  { %v249_v47 = vsub.f32 %v991_v20, %v889_v17  ;;  %v740_v48 = vpop.eup %739  ;;  %v554_v53 = vmul.f32 2.8234622, %v738_v44  ;;  %v373_v46 = vsub.f32 0.0, %v309_v14  ;;  %v312_v55 = vmul.f32 %v248_v43, %v248_v43 }
  0x64   :  { %755 = vpow2.f32 %v478_v41  ;;  %v742_v49 = vpop.eup %741  ;;  %v555_v23 = vmul.f32 2.8234622, %v740_v48  ;;  %v480_v24 = vmul.f32 1.442695, %v372_v16  ;;  %v374_v59 = vsub.f32 0.0, %v310_v45 }
  0x65   :  { %v375_v30 = vsub.f32 0.0, %v311_v15  ;;  %v744_v60 = vpop.eup %743  ;;  %618 = vst [vmem:[#allocation5 + $0x110] sm:$0x3] %v554_v53  ;;  %v556_v54 = vmul.f32 2.8234622, %v742_v49  ;;  %v376_v0 = vsub.f32 0.0, %v312_v55  ;;  %v313_v58 = vmul.f32 %v249_v47, %v249_v47 }
  0x66   :  { %v482_v61 = vmul.f32 1.442695, %v373_v46  ;;  %v746_v1 = vpop.eup %745  ;;  %619 = vst [vmem:[#allocation5 + $0x118] sm:$0x3] %v555_v23  ;;  %v557_v11 = vmul.f32 2.8234622, %v744_v60  ;;  %757 = vpow2.f32 %v480_v24  ;;  %v250_v32 = vsub.f32 %v999_v37, %v889_v17 }
  0x67   :  { %v484_v20 = vmul.f32 1.442695, %v374_v59  ;;  %v486_v18 = vmul.f32 1.442695, %v375_v30  ;;  %v748_v12 = vpop.eup %747  ;;  %620 = vst [vmem:[#allocation5 + $0x120] sm:$0x3] %v556_v54  ;;  %v251_v13 = vsub.f32 %v1003_v42, %v889_v17  ;;  %v252_v25 = vsub.f32 %v1011_v63, %v889_v17 }
  0x68   :  { %v558_v19 = vmul.f32 2.8234622, %v746_v1  ;;  %759 = vpow2.f32 %v482_v61  ;;  %v488_v31 = vmul.f32 1.442695, %v376_v0  ;;  %v377_v62 = vsub.f32 0.0, %v313_v58  ;;  %v750_v5 = vpop.eup %749 }
  0x69   :  { %621 = vst [vmem:[#allocation5 + $0x128] sm:$0x3] %v557_v11  ;;  %v559_v3 = vmul.f32 2.8234622, %v748_v12  ;;  %761 = vpow2.f32 %v484_v20  ;;  %v560_v22 = vmul.f32 2.8234622, %v750_v5  ;;  %v314_v26 = vmul.f32 %v250_v32, %v250_v32 }
  0x6a   :  { %622 = vst [vmem:[#allocation5 + $0x130] sm:$0x3] %v558_v19  ;;  %763 = vpow2.f32 %v486_v18  ;;  %v490_v7 = vmul.f32 1.442695, %v377_v62  ;;  %v315_v35 = vmul.f32 %v251_v13, %v251_v13  ;;  %v253_v36 = vsub.f32 %v1015_v2, %v889_v17 }
  0x6b   :  { %v752_v34 = vpop.eup %751  ;;  %623 = vst [vmem:[#allocation5 + $0x138] sm:$0x3] %v559_v3  ;;  %765 = vpow2.f32 %v488_v31  ;;  %624 = vst [vmem:[#allocation5 + $0x140] sm:$0x3] %v560_v22  ;;  %v316_v42 = vmul.f32 %v252_v25, %v252_v25  ;;  %v254_v6 = vsub.f32 %v1019_v10, %v889_v17  ;;  %v378_v39 = vsub.f32 0.0, %v314_v26 }
  0x6c   :  { %v754_v38 = vpop.eup %753  ;;  %v561_v37 = vmul.f32 2.8234622, %v752_v34  ;;  %767 = vpow2.f32 %v490_v7  ;;  %v379_v8 = vsub.f32 0.0, %v315_v35  ;;  %v317_v63 = vmul.f32 %v253_v36, %v253_v36 }
  0x6d   :  { %v562_v27 = vmul.f32 2.8234622, %v754_v38  ;;  %v380_v40 = vsub.f32 0.0, %v316_v42  ;;  %v318_v29 = vmul.f32 %v254_v6, %v254_v6  ;;  %v255_v41 = vsub.f32 %v1025_v33, %v889_v17 }
  0x6e   :  { %v756_v28 = vpop.eup %755  ;;  %625 = vst [vmem:[#allocation5 + $0x148] sm:$0x3] %v561_v37  ;;  %v256_v2 = vsub.f32 %v1035_v52, %v889_v17  ;;  %v492_v43 = vmul.f32 1.442695, %v378_v39  ;;  %v494_v44 = vmul.f32 1.442695, %v379_v8  ;;  %v257_v10 = vsub.f32 %v1039_v56, %v889_v17 }
  0x6f   :  { %626 = vst [vmem:[#allocation5 + $0x150] sm:$0x3] %v562_v27  ;;  %v563_v14 = vmul.f32 2.8234622, %v756_v28  ;;  %v496_v16 = vmul.f32 1.442695, %v380_v40  ;;  %v319_v47 = vmul.f32 %v255_v41, %v255_v41  ;;  %v258_v33 = vsub.f32 %v1043_v57, %v889_v17 }
  0x70   :  { %v381_v45 = vsub.f32 0.0, %v317_v63  ;;  %v382_v15 = vsub.f32 0.0, %v318_v29  ;;  %v758_v48 = vpop.eup %757  ;;  %769 = vpow2.f32 %v492_v43  ;;  %v320_v53 = vmul.f32 %v256_v2, %v256_v2 }
  0x71   :  { %627 = vst [vmem:[#allocation5 + $0x158] sm:$0x3] %v563_v14  ;;  %v321_v46 = vmul.f32 %v257_v10, %v257_v10  ;;  %v564_v55 = vmul.f32 2.8234622, %v758_v48  ;;  %771 = vpow2.f32 %v494_v44  ;;  %v383_v56 = vsub.f32 0.0, %v319_v47 }
  0x72   :  { %v760_v52 = vpop.eup %759  ;;  %v498_v49 = vmul.f32 1.442695, %v381_v45  ;;  %v500_v23 = vmul.f32 1.442695, %v382_v15  ;;  %773 = vpow2.f32 %v496_v16  ;;  %v384_v30 = vsub.f32 0.0, %v320_v53 }
  0x73   :  { %v762_v24 = vpop.eup %761  ;;  %v565_v59 = vmul.f32 2.8234622, %v760_v52  ;;  %628 = vst [vmem:[#allocation5 + $0x160] sm:$0x3] %v564_v55  ;;  %v385_v61 = vsub.f32 0.0, %v321_v46  ;;  %v322_v0 = vmul.f32 %v258_v33, %v258_v33  ;;  %v259_v31 = vsub.f32 %v1049_v4, %v889_v17 }
  0x74   :  { %v764_v60 = vpop.eup %763  ;;  %v566_v54 = vmul.f32 2.8234622, %v762_v24  ;;  %775 = vpow2.f32 %v498_v49  ;;  %v502_v57 = vmul.f32 1.442695, %v383_v56  ;;  %v504_v11 = vmul.f32 1.442695, %v384_v30 }
  0x75   :  { %v766_v58 = vpop.eup %765  ;;  %629 = vst [vmem:[#allocation5 + $0x168] sm:$0x3] %v565_v59  ;;  %v567_v1 = vmul.f32 2.8234622, %v764_v60  ;;  %777 = vpow2.f32 %v500_v23  ;;  %v506_v12 = vmul.f32 1.442695, %v385_v61  ;;  %v260_v5 = vsub.f32 %v1059_v21, %v889_v17 }
  0x76   :  { %v768_v20 = vpop.eup %767  ;;  %630 = vst [vmem:[#allocation5 + $0x170] sm:$0x3] %v566_v54  ;;  %v568_v18 = vmul.f32 2.8234622, %v766_v58  ;;  %v386_v19 = vsub.f32 0.0, %v322_v0  ;;  %779 = vpow2.f32 %v502_v57  ;;  %v261_v3 = vsub.f32 %v1063_v50, %v889_v17 }
  0x77   :  { %631 = vst [vmem:[#allocation5 + $0x178] sm:$0x3] %v567_v1  ;;  %v569_v62 = vmul.f32 2.8234622, %v768_v20  ;;  %781 = vpow2.f32 %v504_v11  ;;  %v323_v13 = vmul.f32 %v259_v31, %v259_v31  ;;  %v262_v22 = vsub.f32 %v1067_v51, %v889_v17 }
  0x78   :  { %632 = vst [vmem:[#allocation5 + $0x180] sm:$0x3] %v568_v18  ;;  %v508_v32 = vmul.f32 1.442695, %v386_v19  ;;  %783 = vpow2.f32 %v506_v12  ;;  %v324_v7 = vmul.f32 %v260_v5, %v260_v5  ;;  %v325_v4 = vmul.f32 %v261_v3, %v261_v3 }
  0x79   :  { %633 = vst [vmem:[#allocation5 + $0x188] sm:$0x3] %v569_v62  ;;  %v263_v25 = vsub.f32 %v1073_v9, %v889_v17  ;;  %v387_v34 = vsub.f32 0.0, %v323_v13  ;;  %v326_v21 = vmul.f32 %v262_v22, %v262_v22 }
  0x7a   :  { %785 = vpow2.f32 %v508_v32  ;;  %v770_v26 = vpop.eup %769  ;;  %v388_v35 = vsub.f32 0.0, %v324_v7  ;;  %v389_v50 = vsub.f32 0.0, %v325_v4 }
  0x7b   :  { %v327_v36 = vmul.f32 %v263_v25, %v263_v25  ;;  %v772_v38 = vpop.eup %771  ;;  %v570_v37 = vmul.f32 2.8234622, %v770_v26  ;;  %v510_v42 = vmul.f32 1.442695, %v387_v34  ;;  %v390_v6 = vsub.f32 0.0, %v326_v21 }
  0x7c   :  { %v774_v27 = vpop.eup %773  ;;  %v571_v51 = vmul.f32 2.8234622, %v772_v38  ;;  %v512_v39 = vmul.f32 1.442695, %v388_v35  ;;  %v514_v8 = vmul.f32 1.442695, %v389_v50 }
  0x7d   :  { %634 = vst [vmem:[#allocation5 + $0x190] sm:$0x3] %v570_v37  ;;  %v572_v28 = vmul.f32 2.8234622, %v774_v27  ;;  %787 = vpow2.f32 %v510_v42  ;;  %v516_v17 = vmul.f32 1.442695, %v390_v6 }
  0x7e   :  { %v776_v63 = vpop.eup %775  ;;  %v391_v9 = vsub.f32 0.0, %v327_v36  ;;  %635 = vst [vmem:[#allocation5 + $0x198] sm:$0x3] %v571_v51  ;;  %789 = vpow2.f32 %v512_v39 }
  0x7f   :  { %v778_v40 = vpop.eup %777  ;;  %v573_v29 = vmul.f32 2.8234622, %v776_v63  ;;  %636 = vst [vmem:[#allocation5 + $0x1a0] sm:$0x3] %v572_v28  ;;  %791 = vpow2.f32 %v514_v8 }
  0x80   :  { %v574_v41 = vmul.f32 2.8234622, %v778_v40  ;;  %v518_v2 = vmul.f32 1.442695, %v391_v9  ;;  %v780_v14 = vpop.eup %779  ;;  %793 = vpow2.f32 %v516_v17 }
  0x81   :  { %637 = vst [vmem:[#allocation5 + $0x1a8] sm:$0x3] %v573_v29  ;;  %v782_v43 = vpop.eup %781  ;;  %v575_v44 = vmul.f32 2.8234622, %v780_v14 }
  0x82   :  { %638 = vst [vmem:[#allocation5 + $0x1b0] sm:$0x3] %v574_v41  ;;  %795 = vpow2.f32 %v518_v2  ;;  %v784_v10 = vpop.eup %783  ;;  %v576_v16 = vmul.f32 2.8234622, %v782_v43 }
  0x83   :  { %639 = vst [vmem:[#allocation5 + $0x1b8] sm:$0x3] %v575_v44  ;;  %v577_v15 = vmul.f32 2.8234622, %v784_v10 }
  0x84   :  { %v786_v45 = vpop.eup %785  ;;  %640 = vst [vmem:[#allocation5 + $0x1c0] sm:$0x3] %v576_v16 }
  0x85   :  { %v578_v47 = vmul.f32 2.8234622, %v786_v45  ;;  %641 = vst [vmem:[#allocation5 + $0x1c8] sm:$0x3] %v577_v15 }
  0x87   :  { %642 = vst [vmem:[#allocation5 + $0x1d0] sm:$0x3] %v578_v47  ;;  %v788_v48 = vpop.eup %787 }
  0x88   :  { %v790_v53 = vpop.eup %789  ;;  %v579_v46 = vmul.f32 2.8234622, %v788_v48 }
  0x89   :  { %v792_v33 = vpop.eup %791  ;;  %v580_v52 = vmul.f32 2.8234622, %v790_v53 }
  0x8a   :  { %v794_v55 = vpop.eup %793  ;;  %643 = vst [vmem:[#allocation5 + $0x1d8] sm:$0x3] %v579_v46  ;;  %v581_v49 = vmul.f32 2.8234622, %v792_v33 }
  0x8b   :  { %644 = vst [vmem:[#allocation5 + $0x1e0] sm:$0x3] %v580_v52  ;;  %v582_v24 = vmul.f32 2.8234622, %v794_v55 }
  0x8c   :  { %v796_v23 = vpop.eup %795  ;;  %645 = vst [vmem:[#allocation5 + $0x1e8] sm:$0x3] %v581_v49 }
  0x8d   :  { %v583_v59 = vmul.f32 2.8234622, %v796_v23  ;;  %646 = vst [vmem:[#allocation5 + $0x1f0] sm:$0x3] %v582_v24 }
  0x8f   :  { %647 = vst [vmem:[#allocation5 + $0x1f8] sm:$0x3] %v583_v59 }
  0x90   :  { %830 = shalt.err (!%p827_p12)
}
  0x91   :  { %s831_s22 = scalar_lea.hbm %s1158_s1, 8192 }
  0x92   :  { %p832_p13 = scmp.ne.s32.totalorder %s1158_s1, %s831_s22  ;;  %p835_p0 = scmp.lt.u32.totalorder %s831_s22, %s1158_s1 }
  0x94   :  { %p837_p1 = pnand %p835_p0, %p832_p13 }
  0x96   :  { %840 = shalt.err (!%p837_p1)
}
  0x97   :  { %s847_s27 = smov 4096   ;;  %s848_s28 = smov 256  }
  0x98   :  { %659 = dma.vmem_to_hbm [thread:$0]  %s654_s18, 8192, %s1158_s1, [#allocation4], %s847_s27, %s847_s27, %s848_s28  }
  0x99   :  { %843 = dma.done.wait [#allocation4], 8192  }
  0x9a   :  { %844 = vsyncadd [#allocation4], 4294959104 }
  0x9b   :  { %663 = vsyncpa [#allocation3], 1 }
  0x9c   :  { %664 = vsyncpa [#allocation4], 1 }

</bundles_post_ra>
